<compile_context>
chip_gen: v5e
topology: v5e:2x2
jax: 0.10.0
libtpu: 0.0.40
codegen_flags: <defaults>
</compile_context>

<pallas_src>
import math
from functools import partial

import jax
import jax.numpy as jnp
from jax.experimental import pallas as pl
from jax.experimental.pallas import tpu as pltpu


# ---------------------------------------------------------------------------
# Kernels
# ---------------------------------------------------------------------------
def _ffn_kernel_single(x_ref, w1_ref, b1_ref, w2_ref, b2_ref, o_ref):
    """Single hidden tile: out = GELU_tanh(x @ W1 + b1) @ W2 + b2 in one shot."""
    h = jnp.dot(x_ref[...], w1_ref[...], preferred_element_type=jnp.float32)
    h = jax.nn.gelu(h + b1_ref[...], approximate=True)
    # (Dropout p=0.1 -> identity in eval mode)
    out = jnp.dot(h.astype(w2_ref.dtype), w2_ref[...],
                  preferred_element_type=jnp.float32)
    o_ref[...] = (out + b2_ref[...]).astype(o_ref.dtype)


def _ffn_kernel_multi(x_ref, w1_ref, b1_ref, w2_ref, b2_ref, o_ref):
    """Hidden dim tiled: each j-slice's contribution is accumulated directly into
    the resident f32 output block (no separate VMEM accumulator scratch)."""
    j = pl.program_id(1)

    h = jnp.dot(x_ref[...], w1_ref[...], preferred_element_type=jnp.float32)
    h = jax.nn.gelu(h + b1_ref[...], approximate=True)
    # (Dropout p=0.1 -> identity in eval mode)
    contrib = jnp.dot(h.astype(w2_ref.dtype), w2_ref[...],
                      preferred_element_type=jnp.float32)

    @pl.when(j == 0)
    def _init():
        o_ref[...] = contrib + b2_ref[...]

    @pl.when(j > 0)
    def _accum():
        o_ref[...] = o_ref[...] + contrib


# ---------------------------------------------------------------------------
# Tile selection helpers (pure Python, run at trace time)
# ---------------------------------------------------------------------------
def _round_up(x, m):
    return ((x + m - 1) // m) * m


def _device_kind():
    try:
        return jax.devices()[0].device_kind.lower()
    except Exception:
        return ""


def _vmem_capacity_bytes():
    try:
        return int(pltpu.get_tpu_info().vmem_capacity_bytes)
    except Exception:
        return 64 * 2**20  # conservative fallback (v7x per-TC VMEM)


def _pick_hidden_block(hidden, desired):
    """Largest divisor of `hidden` that is a multiple of 128 and <= desired (else full)."""
    if hidden <= desired:
        return hidden
    start = desired - desired % 128
    for cand in range(start, 127, -128):
        if cand > 0 and hidden % cand == 0:
            return cand
    return hidden


def _vmem_need_bytes(bm, bh, in_f):
    """Rough per-core VMEM requirement for one (bm, bh) tile configuration."""
    need = 2 * bm * in_f * 2       # x tile (bf16), double-buffered
    need += 2 * bm * in_f * 4      # out tile (f32 worst case), double-buffered
    need += 2 * in_f * bh * 2      # W1 slice (bf16), double-buffered
    need += 2 * bh * in_f * 2      # W2 slice (bf16), double-buffered
    need += 2 * (bh + in_f) * 4    # bias slices (f32)
    need += bm * bh * 6            # f32 intermediate + bf16 recast temp
    return need


def _pick_tiles(m, in_f, hidden, block_m, block_h):
    kind = _device_kind()
    cap = _vmem_capacity_bytes()
    budget = int(cap * 0.85)

    # Generation-aware defaults (arithmetic intensity ~ bm FLOP per streamed weight byte):
    #   v6e: 128 MiB VMEM, ~640 FLOP/B crossover -> bm ~1024
    #   v7x: 64 MiB/TC, 2 TCs share HBM          -> bm ~512, bh ~1024
    #   v5e: ~240 FLOP/B crossover               -> bm ~512, favor larger bh
    if block_m is not None:
        bm_target = block_m
    elif "v6" in kind:
        bm_target = 1024
    else:
        bm_target = 512

    if block_h is not None:
        bh_target = block_h
    elif ("v7" in kind) or ("7x" in kind):
        bh_target = 1024
    else:
        bh_target = 2048

    bm = min(bm_target, _round_up(m, 8))
    bm = max(8, bm - bm % 8)
    bh = _pick_hidden_block(hidden, bh_target)

    # Shrink until the tiles fit the per-core VMEM budget. Shrink bh first: bm is
    # the dominant arithmetic-intensity lever, preserve it as long as possible.
    while _vmem_need_bytes(bm, bh, in_f) > budget:
        if bh > 512:
            new_bh = _pick_hidden_block(hidden, max(128, bh // 2))
            if new_bh < bh:
                bh = new_bh
                continue
        if bm > 128:
            bm = max(128, bm // 2)
            continue
        if bh > 128:
            new_bh = _pick_hidden_block(hidden, max(128, bh // 2))
            if new_bh < bh:
                bh = new_bh
                continue
        break  # smallest sensible tiles; hand the rest to the compiler

    return bm, bh, cap


# ---------------------------------------------------------------------------
# Wrapper
# ---------------------------------------------------------------------------
@partial(jax.jit, static_argnames=("block_m", "block_h"))
def feed_forward(x, w1, b1, w2, b2, *, block_m=None, block_h=None):
    """Eval-mode forward: Linear -> GELU -> (Dropout) -> Linear -> (Dropout).

    x: (..., in_features). w1: (in, hidden), b1: (hidden,), w2: (hidden, in), b2: (in,).
    Returns same shape/dtype as x.
    """
    in_features = x.shape[-1]
    hidden = w1.shape[-1]
    orig_shape = x.shape
    orig_dtype = x.dtype

    x2d = x.reshape(-1, in_features)
    m = x2d.shape[0]

    bm, bh, vmem_cap = _pick_tiles(m, in_features, hidden, block_m, block_h)

    m_pad = _round_up(m, bm)
    if m_pad != m:
        x2d = jnp.pad(x2d, ((0, m_pad - m), (0, 0)))  # zero rows: benign, sliced off below

    # bf16 MXU operands; f32 biases added to the f32 accumulators.
    x_bf = x2d.astype(jnp.bfloat16)
    w1_bf = w1.astype(jnp.bfloat16)
    w2_bf = w2.astype(jnp.bfloat16)
    b1_f32 = b1.reshape(1, hidden).astype(jnp.float32)
    b2_f32 = b2.reshape(1, in_features).astype(jnp.float32)

    num_m = m_pad // bm
    num_j = hidden // bh
    single_pass = (num_j == 1)

    # Multi-pass accumulates into an f32 output block; cast back outside the kernel.
    out_dtype = orig_dtype if single_pass else jnp.float32
    out_itemsize = jnp.dtype(out_dtype).itemsize

    # VMEM limit derived from the actual tile footprint + headroom, capped at the
    # device's physical per-core VMEM (no arbitrary 48 MiB clamp).
    vmem_limit = int(min(vmem_cap,
                         max(_vmem_need_bytes(bm, bh, in_features) + (4 << 20),
                             32 << 20)))

    # Real traffic: weights (and b1) are re-streamed once per M tile.
    cost = pl.CostEstimate(
        flops=4 * m_pad * in_features * hidden,
        transcendentals=m_pad * hidden,
        bytes_accessed=(x_bf.size * 2
                        + num_m * (w1_bf.size + w2_bf.size) * 2
                        + num_m * (b1_f32.size + num_j * b2_f32.size) * 4
                        + m_pad * in_features * out_itemsize),
    )

    if single_pass:
        grid = (num_m,)
        in_specs = [
            pl.BlockSpec((bm, in_features), lambda i: (i, 0)),        # x tile
            pl.BlockSpec((in_features, hidden), lambda i: (0, 0)),    # W1 (full)
            pl.BlockSpec((1, hidden), lambda i: (0, 0)),              # b1
            pl.BlockSpec((hidden, in_features), lambda i: (0, 0)),    # W2 (full)
            pl.BlockSpec((1, in_features), lambda i: (0, 0)),         # b2
        ]
        out_specs = pl.BlockSpec((bm, in_features), lambda i: (i, 0))
        kernel = _ffn_kernel_single
        dim_sem = ("parallel",)
    else:
        grid = (num_m, num_j)
        in_specs = [
            pl.BlockSpec((bm, in_features), lambda i, j: (i, 0)),     # x tile
            pl.BlockSpec((in_features, bh), lambda i, j: (0, j)),     # W1 slice
            pl.BlockSpec((1, bh), lambda i, j: (0, j)),               # b1 slice
            pl.BlockSpec((bh, in_features), lambda i, j: (j, 0)),     # W2 slice
            pl.BlockSpec((1, in_features), lambda i, j: (0, 0)),      # b2
        ]
        out_specs = pl.BlockSpec((bm, in_features), lambda i, j: (i, 0))
        kernel = _ffn_kernel_multi
        dim_sem = ("parallel", "arbitrary")

    out = pl.pallas_call(
        kernel,
        out_shape=jax.ShapeDtypeStruct((m_pad, in_features), out_dtype),
        grid_spec=pltpu.PrefetchScalarGridSpec(
            num_scalar_prefetch=0,
            grid=grid,
            in_specs=in_specs,
            out_specs=out_specs,
        ),
        compiler_params=pltpu.CompilerParams(
            dimension_semantics=dim_sem,
            vmem_limit_bytes=vmem_limit,
        ),
        cost_estimate=cost,
    )(x_bf, w1_bf, b1_f32, w2_bf, b2_f32)

    if m_pad != m:
        out = out[:m]
    return out.astype(orig_dtype).reshape(orig_shape)


# ---------------------------------------------------------------------------
# Params / references / tests
# ---------------------------------------------------------------------------
def init_params(key, in_features, hidden_features, dtype=jnp.float32):
    """Deterministic synthetic params (shapes match nn.Linear layers, transposed)."""
    k1, k2, k3, k4 = jax.random.split(key, 4)
    s1 = 1.0 / math.sqrt(in_features)
    s2 = 1.0 / math.sqrt(hidden_features)
    w1 = jax.random.uniform(k1, (in_features, hidden_features), dtype, -s1, s1)
    b1 = jax.random.uniform(k2, (hidden_features,), dtype, -s1, s1)
    w2 = jax.random.uniform(k3, (hidden_features, in_features), dtype, -s2, s2)
    b2 = jax.random.uniform(k4, (in_features,), dtype, -s2, s2)
    return w1, b1, w2, b2


def _ref_exact(x2d, w1, b1, w2, b2):
    # Exact module semantics (erf GELU, f32), eval-mode dropout == identity.
    h = jax.nn.gelu(x2d.astype(jnp.float32) @ w1.astype(jnp.float32) + b1, approximate=False)
    return h @ w2.astype(jnp.float32) + b2


def _ref_mixed(x2d, w1, b1, w2, b2):
    # Same dtype policy as the kernel: bf16 MXU operands, f32 accumulate, tanh GELU.
    h = jnp.dot(x2d.astype(jnp.bfloat16), w1.astype(jnp.bfloat16),
                preferred_element_type=jnp.float32) + b1.astype(jnp.float32)
    h = jax.nn.gelu(h, approximate=True)
    return jnp.dot(h.astype(jnp.bfloat16), w2.astype(jnp.bfloat16),
                   preferred_element_type=jnp.float32) + b2.astype(jnp.float32)


if __name__ == "__main__":
    key = jax.random.PRNGKey(0)
    kx1, kp1, kx2, kp2 = jax.random.split(key, 4)

    # --- Test 1: tiny shape -> single-pass kernel path (no accumulation) ---
    batch, seq, in_f, hid = 2, 8, 32, 64
    x = jax.random.normal(kx1, (batch, seq, in_f), dtype=jnp.float32)
    w1, b1, w2, b2 = init_params(kp1, in_f, hid)

    out = jax.block_until_ready(feed_forward(x, w1, b1, w2, b2))
    assert out.shape == x.shape and out.dtype == x.dtype
    r_mixed = _ref_mixed(x.reshape(-1, in_f), w1, b1, w2, b2).reshape(x.shape)
    r_exact = _ref_exact(x.reshape(-1, in_f), w1, b1, w2, b2).reshape(x.shape)
    assert jnp.allclose(out, r_mixed, atol=5e-3, rtol=5e-3), "mismatch vs mixed-precision ref"
    assert jnp.allclose(out, r_exact, atol=5e-2, rtol=5e-2), "mismatch vs exact f32 ref"

    # --- Test 2: exercises M padding, parallel M grid, multi-pass hidden accumulation ---
    batch, seq, in_f, hid = 2, 200, 128, 512   # m=400 -> padded to 512, grid (2, 4)
    x = jax.random.normal(kx2, (batch, seq, in_f), dtype=jnp.float32)
    w1, b1, w2, b2 = init_params(kp2, in_f, hid)

    out = jax.block_until_ready(feed_forward(x, w1, b1, w2, b2, block_m=256, block_h=128))
    assert out.shape == x.shape and out.dtype == x.dtype
    r_mixed = _ref_mixed(x.reshape(-1, in_f), w1, b1, w2, b2).reshape(x.shape)
    r_exact = _ref_exact(x.reshape(-1, in_f), w1, b1, w2, b2).reshape(x.shape)
    assert jnp.allclose(out, r_mixed, atol=5e-3, rtol=5e-3), "mismatch vs mixed-precision ref"
    assert jnp.allclose(out, r_exact, atol=5e-2, rtol=5e-2), "mismatch vs exact f32 ref"

    # --- Test 3: auto (generation-aware) tile selection path ---
    out = jax.block_until_ready(feed_forward(x, w1, b1, w2, b2))
    assert jnp.allclose(out, r_mixed, atol=5e-3, rtol=5e-3), "mismatch (auto tiles)"

    print("KERNEL_OK")
</pallas_src>

<mosaic_0001>
module attributes {stable_mosaic.version = 11 : i64} {
  func.func @_ffn_kernel_single(%arg0: i32, %arg1: memref<16x32xbf16, #tpu.memory_space<vmem>>, %arg2: memref<32x64xbf16, #tpu.memory_space<vmem>>, %arg3: memref<1x64xf32, #tpu.memory_space<vmem>>, %arg4: memref<64x32xbf16, #tpu.memory_space<vmem>>, %arg5: memref<1x32xf32, #tpu.memory_space<vmem>>, %arg6: memref<16x32xf32, #tpu.memory_space<vmem>>) attributes {dimension_semantics = [#tpu.dimension_semantics<parallel>], iteration_bounds = array<i64: 1>, scalar_prefetch = 0 : i64, scratch_operands = 0 : i64, tpu.core_type = #tpu.core_type<tc>, window_params = [{transform_indices = @transform_0, window_bounds = array<i64: 16, 32>}, {pipeline_mode = #tpu.pipeline_mode<synchronous>, transform_indices = @transform_1, window_bounds = array<i64: 32, 64>}, {pipeline_mode = #tpu.pipeline_mode<synchronous>, transform_indices = @transform_2, window_bounds = array<i64: 1, 64>}, {pipeline_mode = #tpu.pipeline_mode<synchronous>, transform_indices = @transform_3, window_bounds = array<i64: 64, 32>}, {pipeline_mode = #tpu.pipeline_mode<synchronous>, transform_indices = @transform_4, window_bounds = array<i64: 1, 32>}, {transform_indices = @transform_5, window_bounds = array<i64: 16, 32>}]} {
    %c0 = arith.constant 0 : index
    %c0_0 = arith.constant 0 : index
    %0 = vector.load %arg1[%c0, %c0_0] : memref<16x32xbf16, #tpu.memory_space<vmem>>, vector<16x32xbf16>
    %c0_1 = arith.constant 0 : index
    %c0_2 = arith.constant 0 : index
    %1 = vector.load %arg2[%c0_1, %c0_2] : memref<32x64xbf16, #tpu.memory_space<vmem>>, vector<32x64xbf16>
    %cst = arith.constant dense<0.000000e+00> : vector<16x64xf32>
    %2 = tpu.matmul %0, %1, %cst {dimension_numbers = #tpu.dot_dimension_numbers<[1], [0], [0], [1], [0, 0, 1, 1], [], []>} : vector<16x32xbf16>, vector<32x64xbf16>, vector<16x64xf32> -> vector<16x64xf32>
    %c0_3 = arith.constant 0 : index
    %c0_4 = arith.constant 0 : index
    %3 = vector.load %arg3[%c0_3, %c0_4] : memref<1x64xf32, #tpu.memory_space<vmem>>, vector<1x64xf32>
    %4 = vector.broadcast %3 : vector<1x64xf32> to vector<16x64xf32>
    %5 = arith.addf %2, %4 : vector<16x64xf32>
    %6 = arith.mulf %5, %5 : vector<16x64xf32>
    %7 = arith.mulf %5, %6 : vector<16x64xf32>
    %cst_5 = arith.constant 4.471500e-02 : f32
    %8 = vector.broadcast %cst_5 : f32 to vector<16x64xf32>
    %9 = arith.mulf %8, %7 : vector<16x64xf32>
    %10 = arith.addf %5, %9 : vector<16x64xf32>
    %cst_6 = arith.constant 0.797884583 : f32
    %11 = vector.broadcast %cst_6 : f32 to vector<16x64xf32>
    %12 = arith.mulf %11, %10 : vector<16x64xf32>
    %13 = math.tanh %12 : vector<16x64xf32>
    %cst_7 = arith.constant 1.000000e+00 : f32
    %14 = vector.broadcast %cst_7 : f32 to vector<16x64xf32>
    %15 = arith.addf %14, %13 : vector<16x64xf32>
    %cst_8 = arith.constant 5.000000e-01 : f32
    %16 = vector.broadcast %cst_8 : f32 to vector<16x64xf32>
    %17 = arith.mulf %16, %15 : vector<16x64xf32>
    %18 = arith.mulf %5, %17 : vector<16x64xf32>
    %19 = arith.truncf %18 : vector<16x64xf32> to vector<16x64xbf16>
    %c0_9 = arith.constant 0 : index
    %c0_10 = arith.constant 0 : index
    %20 = vector.load %arg4[%c0_9, %c0_10] : memref<64x32xbf16, #tpu.memory_space<vmem>>, vector<64x32xbf16>
    %cst_11 = arith.constant dense<0.000000e+00> : vector<16x32xf32>
    %21 = tpu.matmul %19, %20, %cst_11 {dimension_numbers = #tpu.dot_dimension_numbers<[1], [0], [0], [1], [0, 0, 1, 1], [], []>} : vector<16x64xbf16>, vector<64x32xbf16>, vector<16x32xf32> -> vector<16x32xf32>
    %c0_12 = arith.constant 0 : index
    %c0_13 = arith.constant 0 : index
    %22 = vector.load %arg5[%c0_12, %c0_13] : memref<1x32xf32, #tpu.memory_space<vmem>>, vector<1x32xf32>
    %23 = vector.broadcast %22 : vector<1x32xf32> to vector<16x32xf32>
    %24 = arith.addf %21, %23 : vector<16x32xf32>
    %c0_14 = arith.constant 0 : index
    %c0_15 = arith.constant 0 : index
    %25 = vector.load %arg6[%c0_14, %c0_15] : memref<16x32xf32, #tpu.memory_space<vmem>>, vector<16x32xf32>
    tpu.vector_store %arg6[%c0_14, %c0_15], %24 {strides = array<i32>} : memref<16x32xf32, #tpu.memory_space<vmem>>, vector<16x32xf32>,
    return
  }
  func.func @transform_0(%arg0: i32) -> (i32, i32) {
    %c0_i32 = arith.constant 0 : i32
    %c0_i32_0 = arith.constant 0 : i32
    return %arg0, %c0_i32 : i32, i32
  }
  func.func @transform_1(%arg0: i32) -> (i32, i32) {
    %c0_i32 = arith.constant 0 : i32
    %c0_i32_0 = arith.constant 0 : i32
    %c0_i32_1 = arith.constant 0 : i32
    return %c0_i32, %c0_i32_0 : i32, i32
  }
  func.func @transform_2(%arg0: i32) -> (i32, i32) {
    %c0_i32 = arith.constant 0 : i32
    %c0_i32_0 = arith.constant 0 : i32
    %c0_i32_1 = arith.constant 0 : i32
    return %c0_i32, %c0_i32_0 : i32, i32
  }
  func.func @transform_3(%arg0: i32) -> (i32, i32) {
    %c0_i32 = arith.constant 0 : i32
    %c0_i32_0 = arith.constant 0 : i32
    %c0_i32_1 = arith.constant 0 : i32
    return %c0_i32, %c0_i32_0 : i32, i32
  }
  func.func @transform_4(%arg0: i32) -> (i32, i32) {
    %c0_i32 = arith.constant 0 : i32
    %c0_i32_0 = arith.constant 0 : i32
    %c0_i32_1 = arith.constant 0 : i32
    return %c0_i32, %c0_i32_0 : i32, i32
  }
  func.func @transform_5(%arg0: i32) -> (i32, i32) {
    %c0_i32 = arith.constant 0 : i32
    %c0_i32_0 = arith.constant 0 : i32
    return %arg0, %c0_i32 : i32, i32
  }
}

</mosaic_0001>

<bundles_post_ra>
// kernel: feed_forward.1
= control target key start
LH: loop header
LB: loop body
LE: loop exit
PB: predicated region body
PF: predicated region fallthrough
CT: control target
= control target key end

     0   :  { %s298_s0 = inlined_call_operand.vmem [shape: bf16[16,32], index: 0, kind: input, shape index: {}]   ;;  %s299_s1 = inlined_call_operand.vmem [shape: bf16[32,64], index: 1, kind: input, shape index: {}]   ;;  %s300_s2 = inlined_call_operand.vmem [shape: f32[1,64], index: 2, kind: input, shape index: {}]   ;;  %s301_s3 = inlined_call_operand.vmem [shape: bf16[64,32], index: 3, kind: input, shape index: {}]   ;;  %s302_s4 = inlined_call_operand.vmem [shape: f32[1,32], index: 4, kind: input, shape index: {}]   ;;  %s303_s5 = inlined_call_operand.hbm [shape: f32[16,32], index: 5, kind: output, shape index: {}]  }
   0x1   :  { %v192_v0 = vld [vmem:[%s299_s1 + $0x8] sm:$0xff]  ;;  %v191_v1 = vld [vmem:[%s299_s1] sm:$0xff] }
   0x2   :  { %59 = vmatpush.bf16.msra.mxu0 %v192_v0 }
   0x3   :  { %10 = vsyncpa [#allocation3], 0  ;;  %v190_v2 = vld [vmem:[%s298_s0] sm:$0xff]  ;;  %vm49_vm0 = vcmask 261120   ;;  %v196_v3 = vld [vmem:[%s301_s3 + $0x18] sm:$0xff]  ;;  %vm122_vm1 = vcmask 523264  }
   0x4   :  { %130 = vmatpush.bf16.msra.mxu1 %v196_v3  ;;  %v195_v4 = vld [vmem:[%s301_s3 + $0x10] sm:$0xff]  ;;  %v194_v5 = vld [vmem:[%s301_s3 + $0x8] sm:$0xff]  ;;  %v200_v6 = vld [vmem:[%s300_s2] ss:$0 sm:$0xff]  ;;  %s232_s7 = smov [#allocation2]   ;;  %s148_s11 = sshll.u32 %s303_s5, 4  ;;  %s149_s11 = int_to_ptr.hbm [resolvable:$true] %s148_s11 }
   0x5   :  { %v193_v7 = vld [vmem:[%s301_s3] sm:$0xff]  ;;  %s146_s8 = sshll.u32 %s232_s7, 4  ;;  %s233_s12 = smov 128   ;;  %s147_s8 = int_to_ptr.vmem [resolvable:$true] %s146_s8 }
   0x6   :  { %60 = vmatpush.bf16.msra.mxu0 %v191_v1  ;;  %v201_v31 = vld [vmem:[%s302_s4] ss:$0 sm:$0xff]  ;;  %s234_s13 = smov 8  }
   0x8   :  { %131 = vmatpush.bf16.msra.mxu1 %v195_v4 }
   0x9   :  { %172 = vmatmul.msk.bf16.vlgmr.msra.gmra.mxu0 %vm49_vm0, %v190_v2 }
   0xc   :  { %132 = vmatpush.bf16.msra.mxu1 %v194_v5 }
  0x10   :  { %133 = vmatpush.bf16.msra.mxu1 %v193_v7 }
  0x86   :  { %v62_v8 = vpop.f32.mrf.mxu0 }
  0x87   :  { %v63_v9 = vadd.f32 %v200_v6, %v62_v8 }
  0x89   :  { %v67_v10 = vmul.f32 %v63_v9, %v63_v9 }
  0x8b   :  { %v69_v11 = vmul.f32 %v67_v10, %v63_v9 }
  0x8d   :  { %v71_v12 = vmul.f32 0.044715, %v69_v11 }
  0x8e   :  { %v64_v13 = vpop.f32.mrf.mxu0 }
  0x8f   :  { %v73_v14 = vadd.f32 %v71_v12, %v63_v9  ;;  %v65_v15 = vadd.f32 %v200_v6, %v64_v13 }
  0x91   :  { %v75_v16 = vmul.f32 0.7978846, %v73_v14  ;;  %v68_v17 = vmul.f32 %v65_v15, %v65_v15 }
  0x93   :  { %v70_v18 = vmul.f32 %v68_v17, %v65_v15  ;;  %202 = vtanh.f32 %v75_v16 }
  0x95   :  { %v72_v19 = vmul.f32 0.044715, %v70_v18 }
  0x97   :  { %v74_v20 = vadd.f32 %v72_v19, %v65_v15 }
  0x99   :  { %v76_v21 = vmul.f32 0.7978846, %v74_v20  ;;  %v203_v22 = vpop.eup %202 }
  0x9a   :  { %v79_v23 = vadd.f32 1.0, %v203_v22 }
  0x9b   :  { %204 = vtanh.f32 %v76_v21 }
  0x9c   :  { %v81_v26 = vmul.f32 0.5, %v79_v23 }
  0x9e   :  { %v83_v28 = vmul.f32 %v81_v26, %v63_v9 }
  0xa1   :  { %v205_v24 = vpop.eup %204 }
  0xa2   :  { %v80_v25 = vadd.f32 1.0, %v205_v24 }
  0xa4   :  { %v82_v27 = vmul.f32 0.5, %v80_v25 }
  0xa6   :  { %v84_v29 = vmul.f32 %v82_v27, %v65_v15 }
  0xa8   :  { %v85_v30 = vpack.c.bf16 %v84_v29, %v83_v28 }
  0xaa   :  { %189 = vmatmul.msk.bf16.vlgmr.msra.gmra.mxu1 %vm122_vm1, %v85_v30 }
 0x127   :  { %v135_v32 = vpop.f32.mrf.mxu1 }
 0x128   :  { %v136_v33 = vadd.f32 %v201_v31, %v135_v32 }
 0x12a   :  { %140 = vst.msk [vmem:[#allocation2] sm:$0xff] %vm49_vm0, %v136_v33 }
 0x12f   :  { %v137_v34 = vpop.f32.mrf.mxu1 }
 0x130   :  { %v138_v35 = vadd.f32 %v201_v31, %v137_v34 }
 0x132   :  { %141 = vst.msk [vmem:[#allocation2 + $0x8] sm:$0xff] %vm49_vm0, %v138_v35 }
 0x133   :  { %154 = dma.vmem_to_hbm [thread:$0]  %s147_s8, 256, %s149_s11, [#allocation3], %s233_s12, %s233_s12, %s234_s13  }
 0x134   :  { %230 = dma.done.wait [#allocation3], 256  }
 0x135   :  { %231 = vsyncadd [#allocation3], 4294967040 }
 0x136   :  { %159 = vsyncpa [#allocation3], 1 }

</bundles_post_ra>
